<compile_context>
chip_gen: v7x
topology: tpu7x:2x2x1
jax: 0.10.0
libtpu: 0.0.40
codegen_flags: <defaults>
</compile_context>

<pallas_src>
import numpy as np
import jax
import jax.numpy as jnp
from jax.experimental import pallas as pl
from jax.experimental.pallas import tpu as pltpu


# --------------------------------------------------------------------------------------
# Pallas kernels (one fused kernel per fusion method)
# --------------------------------------------------------------------------------------

def _concat_fusion_kernel(g_ref, c_ref, wg_ref, wc_ref, b_ref, o_ref):
    """out = concat([graph, custom], -1) @ W + b == graph @ W[:G] + custom @ W[G:] + b"""
    out = jnp.dot(g_ref[...], wg_ref[...], preferred_element_type=jnp.float32)
    out = out + jnp.dot(c_ref[...], wc_ref[...], preferred_element_type=jnp.float32)
    o_ref[...] = out + b_ref[...]


def _gated_fusion_kernel(g_ref, c_ref, w1g_ref, w1c_ref, b1_ref,
                         w2_ref, b2_ref, wo_ref, bo_ref, o_ref):
    """gate = sigmoid(W2 @ relu(W1 @ concat)); out = (graph * gate) @ Wo + bo.
    Matmul operands stay in compute dtype (bf16/f32); all elementwise math in f32
    (sigmoid rides the EUP slot, free next to the matmuls)."""
    g = g_ref[...]
    h = (jnp.dot(g, w1g_ref[...], preferred_element_type=jnp.float32)
         + jnp.dot(c_ref[...], w1c_ref[...], preferred_element_type=jnp.float32)
         + b1_ref[...])
    h = jnp.maximum(h, 0.0)                                            # ReLU (f32)
    gate = jax.nn.sigmoid(
        jnp.dot(h.astype(w2_ref.dtype), w2_ref[...],
                preferred_element_type=jnp.float32) + b2_ref[...])     # f32
    gated = (g.astype(jnp.float32) * gate).astype(wo_ref.dtype)
    o_ref[...] = (jnp.dot(gated, wo_ref[...], preferred_element_type=jnp.float32)
                  + bo_ref[...])


def _attention_fusion_kernel(c_ref, w_att_ref, b_att_ref, o_ref):
    """MultiheadAttention with a single key/value token: softmax over 1 key == 1.0, so the
    path output_proj(attn_out_proj(attn_v_proj(feature_proj(custom)))) is affine and has
    been folded at init into one [C, O_pad] weight + [1, O_pad] bias. One matmul + bias."""
    o_ref[...] = (jnp.dot(c_ref[...], w_att_ref[...], preferred_element_type=jnp.float32)
                  + b_att_ref[...])


# --------------------------------------------------------------------------------------
# pallas_call wrapper: batch-tiled grid, weights resident in VMEM across iterations
# --------------------------------------------------------------------------------------

_MAX_TM = 2048  # rows per batch tile; per-step overhead (~0.35 us) dominates, so go big


def _round_up(x, m):
    return -(-x // m) * m


def _choose_tm(batch):
    if batch <= _MAX_TM:
        return batch                       # single grid step; block == full array is legal
    steps = pl.cdiv(batch, _MAX_TM)
    steps = _round_up(steps, 2)            # even step count -> v7x's 2 TCs split evenly
    # multiple of 16 keeps the block legal for both bf16 (16,128) and f32 (8,128) tiles
    return _round_up(pl.cdiv(batch, steps), 16)


def _run_fused(kernel, batch, out_pad, acts, weights, *, flops, transcendentals=0):
    tm = _choose_tm(batch)
    grid = (pl.cdiv(batch, tm),)

    act_specs = [pl.BlockSpec((tm, a.shape[1]), lambda i: (i, 0)) for a in acts]
    # weights/biases: full-array blocks, same block every grid step -> stay VMEM-resident
    w_specs = [pl.BlockSpec(w.shape, lambda i: (0, 0)) for w in weights]
    out_spec = pl.BlockSpec((tm, out_pad), lambda i: (i, 0))

    bytes_accessed = (sum(int(np.prod(a.shape)) * a.dtype.itemsize for a in acts)
                      + sum(int(np.prod(w.shape)) * w.dtype.itemsize for w in weights)
                      + batch * out_pad * 4)
    cost = pl.CostEstimate(flops=flops, transcendentals=transcendentals,
                           bytes_accessed=bytes_accessed)

    return pl.pallas_call(
        kernel,
        grid=grid,
        in_specs=act_specs + w_specs,
        out_specs=out_spec,
        out_shape=jax.ShapeDtypeStruct((batch, out_pad), jnp.float32),
        compiler_params=pltpu.CompilerParams(
            dimension_semantics=("parallel",),   # batch axis: shard across TCs on v7x
            vmem_limit_bytes=32 * 1024 * 1024,   # harmless; footprint is <3 MiB at TM=2048
        ),
        cost_estimate=cost,
    )(*acts, *weights)


# --------------------------------------------------------------------------------------
# CustomFusionLayer (JAX side): parameter setup (pre-split / pre-folded / pre-padded)
# --------------------------------------------------------------------------------------

class CustomFusionLayerPallas:
    def __init__(self, custom_feature_dim, graph_embed_dim, output_dim,
                 fusion_method="concatenate", key=None, compute_dtype=jnp.bfloat16):
        self.C = custom_feature_dim
        self.G = graph_embed_dim
        self.O = output_dim
        self.O_pad = _round_up(output_dim, 128)      # lane-dense output block
        self.fusion_method = fusion_method
        self.compute_dtype = compute_dtype
        key = jax.random.PRNGKey(0) if key is None else key

        def lin(k, fan_in, fan_out):
            kw, kb = jax.random.split(k)
            w = (jax.random.normal(kw, (fan_in, fan_out), jnp.float32)
                 / jnp.sqrt(jnp.float32(fan_in)))
            b = 0.01 * jax.random.normal(kb, (1, fan_out), jnp.float32)
            return w, b

        def pad_out(x):                               # zero-pad last axis O -> O_pad
            return jnp.pad(x, ((0, 0), (0, self.O_pad - x.shape[-1])))

        cd = compute_dtype
        if fusion_method == "concatenate":
            (k1,) = jax.random.split(key, 1)
            self.w_fuse, self.b_fuse = lin(k1, self.G + self.C, self.O)   # f32 reference
            w_pad = pad_out(self.w_fuse)
            self.wg_k = w_pad[: self.G].astype(cd)    # pre-split + pre-padded at init
            self.wc_k = w_pad[self.G:].astype(cd)
            self.b_k = pad_out(self.b_fuse)           # bias stays f32
        elif fusion_method == "gated":
            k1, k2, k3 = jax.random.split(key, 3)
            self.w1, self.b1 = lin(k1, self.G + self.C, 128)   # gate hidden
            self.w2, self.b2 = lin(k2, 128, self.G)            # gate out (sigmoid)
            self.wo, self.bo = lin(k3, self.G, self.O)         # output_proj
            self.w1g_k = self.w1[: self.G].astype(cd)
            self.w1c_k = self.w1[self.G:].astype(cd)
            self.b1_k = self.b1
            self.w2_k = self.w2.astype(cd)
            self.b2_k = self.b2
            self.wo_k = pad_out(self.wo).astype(cd)
            self.bo_k = pad_out(self.bo)
        elif fusion_method == "attention":
            k1, k2, k3, k4 = jax.random.split(key, 4)
            self.wfp, self.bfp = lin(k1, self.C, self.G)        # feature_proj
            self.wv, self.bv = lin(k2, self.G, self.G)          # attention V projection
            self.woa, self.boa = lin(k3, self.G, self.G)        # attention out_proj
            self.wout, self.bout = lin(k4, self.G, self.O)      # output_proj
            # single-key softmax == 1  =>  whole path is affine; fold once at init (f32).
            w_att = self.wfp @ self.wv @ self.woa @ self.wout                 # [C, O]
            b_att = (((self.bfp @ self.wv + self.bv) @ self.woa + self.boa)
                     @ self.wout + self.bout)                                 # [1, O]
            self.w_att_k = pad_out(w_att).astype(cd)
            self.b_att_k = pad_out(b_att)
        elif fusion_method == "transformer":
            # TODO(synk): 2-layer nn.TransformerEncoder (8-head self-attn over a 2-token
            # sequence + FFN + LayerNorms) not ported; the other three paths are implemented.
            raise NotImplementedError("transformer fusion path not implemented")
        else:
            raise ValueError(fusion_method)

    def __call__(self, graph_embedding, custom_features):
        B = graph_embedding.shape[0]
        g = graph_embedding.astype(self.compute_dtype)
        c = custom_features.astype(self.compute_dtype)

        if self.fusion_method == "concatenate":
            out = _run_fused(
                _concat_fusion_kernel, B, self.O_pad,
                [g, c], [self.wg_k, self.wc_k, self.b_k],
                flops=2 * B * (self.G + self.C) * self.O_pad)
        elif self.fusion_method == "gated":
            out = _run_fused(
                _gated_fusion_kernel, B, self.O_pad,
                [g, c],
                [self.w1g_k, self.w1c_k, self.b1_k,
                 self.w2_k, self.b2_k, self.wo_k, self.bo_k],
                flops=(2 * B * (self.G + self.C) * 128
                       + 2 * B * 128 * self.G
                       + 2 * B * self.G * self.O_pad + 2 * B * self.G),
                transcendentals=B * self.G)
        elif self.fusion_method == "attention":
            # graph_embedding only feeds the Q projection; with a single key the softmax
            # weight is identically 1.0, so it does not influence the result.
            out = _run_fused(
                _attention_fusion_kernel, B, self.O_pad,
                [c], [self.w_att_k, self.b_att_k],
                flops=2 * B * self.C * self.O_pad)
        else:
            raise ValueError(self.fusion_method)
        return out[:, : self.O]          # drop the lane padding outside the kernel


# --------------------------------------------------------------------------------------
# Pure-JAX references (use the UN-folded / UN-split / UN-padded f32 parameters)
# --------------------------------------------------------------------------------------

def _ref_concat(m, g, c):
    comb = jnp.concatenate([g, c], axis=-1)
    return comb @ m.w_fuse + m.b_fuse


def _ref_gated(m, g, c):
    comb = jnp.concatenate([g, c], axis=-1)
    h = jnp.maximum(comb @ m.w1 + m.b1, 0.0)
    gate = jax.nn.sigmoid(h @ m.w2 + m.b2)
    return (g * gate) @ m.wo + m.bo


def _ref_attention(m, g, c):
    cp = c @ m.wfp + m.bfp
    v = cp @ m.wv + m.bv
    att = v @ m.woa + m.boa          # softmax over single key == 1
    return att @ m.wout + m.bout


# --------------------------------------------------------------------------------------
# main
# --------------------------------------------------------------------------------------

if __name__ == "__main__":
    C_DIM, G_DIM, O_DIM = 16, 32, 8

    key = jax.random.PRNGKey(0)
    kg, kc, kp1, kp2, kp3 = jax.random.split(key, 5)

    ok = True

    # small demo batch (single grid step, block == full array) + a large batch that
    # exercises the multi-step tiled grid with an even step count and a partial last block
    for B in (2, 4100):
        graph_embedding = jax.random.normal(kg, (B, G_DIM), jnp.float32)
        custom_features = jax.random.normal(kc, (B, C_DIM), jnp.float32)

        for method, pkey, ref_fn in [
            ("concatenate", kp1, _ref_concat),
            ("gated", kp2, _ref_gated),
            ("attention", kp3, _ref_attention),
        ]:
            for cdt, rtol, atol in ((jnp.float32, 1e-4, 1e-4),
                                    (jnp.bfloat16, 5e-2, 5e-2)):
                layer = CustomFusionLayerPallas(C_DIM, G_DIM, O_DIM, method,
                                                key=pkey, compute_dtype=cdt)
                out = jax.block_until_ready(layer(graph_embedding, custom_features))
                ref = ref_fn(layer, graph_embedding, custom_features)
                if out.shape != (B, O_DIM) or not np.allclose(
                        np.asarray(out), np.asarray(ref), rtol=rtol, atol=atol):
                    ok = False
                    print(f"MISMATCH: method={method} B={B} dtype={jnp.dtype(cdt).name}")

    if ok:
        print("KERNEL_OK")
</pallas_src>

<mosaic_0001>
module attributes {stable_mosaic.version = 11 : i64} {
  func.func @_concat_fusion_kernel(%arg0: i32, %arg1: memref<2x32xf32, #tpu.memory_space<vmem>>, %arg2: memref<2x16xf32, #tpu.memory_space<vmem>>, %arg3: memref<32x128xf32, #tpu.memory_space<vmem>>, %arg4: memref<16x128xf32, #tpu.memory_space<vmem>>, %arg5: memref<1x128xf32, #tpu.memory_space<vmem>>, %arg6: memref<2x128xf32, #tpu.memory_space<vmem>>) attributes {dimension_semantics = [#tpu.dimension_semantics<parallel>], iteration_bounds = array<i64: 1>, scalar_prefetch = 0 : i64, scratch_operands = 0 : i64, tpu.core_type = #tpu.core_type<tc>, window_params = [{transform_indices = @transform_0, window_bounds = array<i64: 2, 32>}, {transform_indices = @transform_1, window_bounds = array<i64: 2, 16>}, {pipeline_mode = #tpu.pipeline_mode<synchronous>, transform_indices = @transform_2, window_bounds = array<i64: 32, 128>}, {pipeline_mode = #tpu.pipeline_mode<synchronous>, transform_indices = @transform_3, window_bounds = array<i64: 16, 128>}, {pipeline_mode = #tpu.pipeline_mode<synchronous>, transform_indices = @transform_4, window_bounds = array<i64: 1, 128>}, {transform_indices = @transform_5, window_bounds = array<i64: 2, 128>}]} {
    %c0 = arith.constant 0 : index
    %c0_0 = arith.constant 0 : index
    %0 = vector.load %arg1[%c0, %c0_0] : memref<2x32xf32, #tpu.memory_space<vmem>>, vector<2x32xf32>
    %c0_1 = arith.constant 0 : index
    %c0_2 = arith.constant 0 : index
    %1 = vector.load %arg3[%c0_1, %c0_2] : memref<32x128xf32, #tpu.memory_space<vmem>>, vector<32x128xf32>
    %cst = arith.constant dense<0.000000e+00> : vector<2x128xf32>
    %2 = tpu.matmul %0, %1, %cst {dimension_numbers = #tpu.dot_dimension_numbers<[1], [0], [0], [1], [0, 0, 1, 1], [], []>} : vector<2x32xf32>, vector<32x128xf32>, vector<2x128xf32> -> vector<2x128xf32>
    %c0_3 = arith.constant 0 : index
    %c0_4 = arith.constant 0 : index
    %3 = vector.load %arg2[%c0_3, %c0_4] : memref<2x16xf32, #tpu.memory_space<vmem>>, vector<2x16xf32>
    %c0_5 = arith.constant 0 : index
    %c0_6 = arith.constant 0 : index
    %4 = vector.load %arg4[%c0_5, %c0_6] : memref<16x128xf32, #tpu.memory_space<vmem>>, vector<16x128xf32>
    %cst_7 = arith.constant dense<0.000000e+00> : vector<2x128xf32>
    %5 = tpu.matmul %3, %4, %cst_7 {dimension_numbers = #tpu.dot_dimension_numbers<[1], [0], [0], [1], [0, 0, 1, 1], [], []>} : vector<2x16xf32>, vector<16x128xf32>, vector<2x128xf32> -> vector<2x128xf32>
    %6 = arith.addf %2, %5 : vector<2x128xf32>
    %c0_8 = arith.constant 0 : index
    %c0_9 = arith.constant 0 : index
    %7 = vector.load %arg5[%c0_8, %c0_9] : memref<1x128xf32, #tpu.memory_space<vmem>>, vector<1x128xf32>
    %8 = vector.broadcast %7 : vector<1x128xf32> to vector<2x128xf32>
    %9 = arith.addf %6, %8 : vector<2x128xf32>
    %c0_10 = arith.constant 0 : index
    %c0_11 = arith.constant 0 : index
    %10 = vector.load %arg6[%c0_10, %c0_11] : memref<2x128xf32, #tpu.memory_space<vmem>>, vector<2x128xf32>
    tpu.vector_store %arg6[%c0_10, %c0_11], %9 {strides = array<i32>} : memref<2x128xf32, #tpu.memory_space<vmem>>, vector<2x128xf32>,
    return
  }
  func.func @transform_0(%arg0: i32) -> (i32, i32) {
    %c0_i32 = arith.constant 0 : i32
    %c0_i32_0 = arith.constant 0 : i32
    return %arg0, %c0_i32 : i32, i32
  }
  func.func @transform_1(%arg0: i32) -> (i32, i32) {
    %c0_i32 = arith.constant 0 : i32
    %c0_i32_0 = arith.constant 0 : i32
    return %arg0, %c0_i32 : i32, i32
  }
  func.func @transform_2(%arg0: i32) -> (i32, i32) {
    %c0_i32 = arith.constant 0 : i32
    %c0_i32_0 = arith.constant 0 : i32
    %c0_i32_1 = arith.constant 0 : i32
    return %c0_i32, %c0_i32_0 : i32, i32
  }
  func.func @transform_3(%arg0: i32) -> (i32, i32) {
    %c0_i32 = arith.constant 0 : i32
    %c0_i32_0 = arith.constant 0 : i32
    %c0_i32_1 = arith.constant 0 : i32
    return %c0_i32, %c0_i32_0 : i32, i32
  }
  func.func @transform_4(%arg0: i32) -> (i32, i32) {
    %c0_i32 = arith.constant 0 : i32
    %c0_i32_0 = arith.constant 0 : i32
    %c0_i32_1 = arith.constant 0 : i32
    return %c0_i32, %c0_i32_0 : i32, i32
  }
  func.func @transform_5(%arg0: i32) -> (i32, i32) {
    %c0_i32 = arith.constant 0 : i32
    %c0_i32_0 = arith.constant 0 : i32
    return %arg0, %c0_i32 : i32, i32
  }
}

</mosaic_0001>

<bundles_post_ra>
// kernel: tpu_custom_call.1
= control target key start
LH: loop header
LB: loop body
LE: loop exit
PB: predicated region body
PF: predicated region fallthrough
CT: control target
= control target key end

     0   :  { %10 = vsyncpa [#allocation3], 0  ;;  %s481_s0 = inlined_call_operand.hbm [shape: f32[2,32], index: 0, kind: input, shape index: {}]   ;;  %s482_s1 = inlined_call_operand.vmem [shape: f32[2,16], index: 1, kind: input, shape index: {}]   ;;  %s483_s2 = inlined_call_operand.hbm [shape: f32[32,128], index: 2, kind: input, shape index: {}]   ;;  %s484_s3 = inlined_call_operand.hbm [shape: f32[16,128], index: 3, kind: input, shape index: {}]   ;;  %s485_s4 = inlined_call_operand.vmem [shape: f32[1,128], index: 4, kind: input, shape index: {}]   ;;  %s486_s5 = inlined_call_operand.hbm [shape: f32[2,128], index: 5, kind: output, shape index: {}]  }
   0x1   :  { %11 = vsyncpa [#allocation6], 0 }
   0x2   :  { %12 = vsyncpa [#allocation4], 0  ;;  %s382_s18 = smov [#allocation5]   ;;  %s288_s22 = scalar_lea.hbm %s483_s2, 512 }
   0x3   :  { %s30_s19 = sshll.u32 %s382_s18, 4  ;;  %p289_p0 = scmp.ne.s32.totalorder %s483_s2, %s288_s22  ;;  %s31_s19 = int_to_ptr.vmem [resolvable:$true] %s30_s19 }
   0x4   :  { %p292_p1 = scmp.lt.u32.totalorder %s288_s22, %s483_s2 }
   0x6   :  { %p294_p2 = pnand %p292_p1, %p289_p0 }
   0x8   :  { %297 = shalt.err (!%p294_p2)
}
   0x9   :  { %s298_s27 = scalar_lea.vmem %s31_s19, 512  ;;  %p303_p4 = scmp.lt.s32.totalorder %s31_s19, %s31_s19 }
   0xa   :  { %p299_p3 = scmp.ne.s32.totalorder %s31_s19, %s298_s27  ;;  %p304_p5 = scmp.lt.s32.totalorder %s298_s27, %s298_s27 }
   0xc   :  { %p305_p6 = por %p304_p5, %p303_p4 }
   0xe   :  { %p306_p7 = pnand %p305_p6, %p299_p3 }
  0x10   :  { %309 = shalt.err (!%p306_p7)
}
  0x11   :  { %s383_s28 = smov 128   ;;  %s384_s29 = smov 8  }
  0x12   :  { %36 = dma.hbm_to_vmem [thread:$0]  %s483_s2, 512, %s31_s19, [#allocation6], %s383_s28, %s383_s28, %s384_s29  }
  0x13   :  { %s385_s7 = smov [#allocation2]   ;;  %s386_s9 = smov [#allocation7]  }
  0x14   :  { %s19_s8 = sshll.u32 %s385_s7, 4  ;;  %s42_s10 = sshll.u32 %s386_s9, 4  ;;  %s20_s8 = int_to_ptr.vmem [resolvable:$true] %s19_s8  ;;  %s43_s10 = int_to_ptr.vmem [resolvable:$true] %s42_s10 }
  0x15   :  { %s310_s13 = scalar_lea.hbm %s481_s0, 32 }
  0x16   :  { %p311_p8 = scmp.ne.s32.totalorder %s481_s0, %s310_s13  ;;  %p314_p9 = scmp.lt.u32.totalorder %s310_s13, %s481_s0 }
  0x18   :  { %p316_p10 = pnand %p314_p9, %p311_p8 }
  0x1a   :  { %319 = shalt.err (!%p316_p10)
}
  0x1b   :  { %s320_s2 = scalar_lea.vmem %s20_s8, 32  ;;  %p325_p12 = scmp.lt.s32.totalorder %s20_s8, %s20_s8 }
  0x1c   :  { %p321_p11 = scmp.ne.s32.totalorder %s20_s8, %s320_s2  ;;  %p326_p13 = scmp.lt.s32.totalorder %s320_s2, %s320_s2 }
  0x1e   :  { %p327_p0 = por %p326_p13, %p325_p12 }
  0x20   :  { %p328_p1 = pnand %p327_p0, %p321_p11 }
  0x22   :  { %331 = shalt.err (!%p328_p1)
}
  0x23   :  { %22 = dma.hbm_to_vmem [thread:$0]  %s481_s0, 32, %s20_s8, [#allocation3]  }
  0x24   :  { %s332_s22 = scalar_lea.hbm %s484_s3, 256 }
  0x25   :  { %p333_p2 = scmp.ne.s32.totalorder %s484_s3, %s332_s22  ;;  %p336_p3 = scmp.lt.u32.totalorder %s332_s22, %s484_s3 }
  0x27   :  { %p338_p4 = pnand %p336_p3, %p333_p2 }
  0x29   :  { %341 = shalt.err (!%p338_p4)
}
  0x2a   :  { %s342_s27 = scalar_lea.vmem %s43_s10, 256  ;;  %p347_p6 = scmp.lt.s32.totalorder %s43_s10, %s43_s10 }
  0x2b   :  { %p343_p5 = scmp.ne.s32.totalorder %s43_s10, %s342_s27  ;;  %p348_p7 = scmp.lt.s32.totalorder %s342_s27, %s342_s27 }
  0x2d   :  { %p349_p8 = por %p348_p7, %p347_p6 }
  0x2f   :  { %p350_p9 = pnand %p349_p8, %p343_p5 }
  0x31   :  { %353 = shalt.err (!%p350_p9)
}
  0x32   :  { %48 = dma.hbm_to_vmem [thread:$0]  %s484_s3, 256, %s43_s10, [#allocation6], %s383_s28, %s383_s28, %s384_s29  }
  0x33   :  { %376 = dma.done.wait [#allocation3], 32  }
  0x34   :  { %377 = vsyncadd [#allocation3], 4294967264 }
  0x35   :  { %378 = dma.done.wait [#allocation6], 768  }
  0x36   :  { %379 = vsyncadd [#allocation6], 4294966528  ;;  %v387_v0 = vmov 0.0|0.0   ;;  %vm388_vm0 = vmmov 0   ;;  %v389_v1 = vmov 0.0   ;;  %v61_v2 = vld [vmem:[#allocation5] sm:$0xff] }
  0x37   :  { %273 = vmatprep.subr.bf16.mxu1 %v387_v0  ;;  %270 = vmatprep.subr.bf16.mxu0 %v387_v0  ;;  %v62_v3 = vld [vmem:[#allocation5 + $0x8] sm:$0xff]  ;;  %v66_v4 = vld [vmem:[#allocation7] sm:$0xff]  ;;  %v63_v7 = vld [vmem:[#allocation5 + $0x10] sm:$0xff]  ;;  %vm68_vm1 = vcmask 130048   ;;  %vm142_vm2 = vcmask 261120   ;;  %s390_s7 = smov [#allocation8]  }
  0x38   :  { %256 = vmatprep.mubr.msk.f32.mxu0 %vm388_vm0, %v389_v1  ;;  %267 = vmatprep.mubr.msk.f32.mxu1 %vm388_vm0, %v389_v1  ;;  %v274_v5 = vpack.c.bf16 %v62_v3, %v61_v2  ;;  %v67_v6 = vld [vmem:[#allocation7 + $0x8] sm:$0xff]  ;;  %v64_v8 = vld [vmem:[#allocation5 + $0x18] sm:$0xff]  ;;  %s231_s8 = sshll.u32 %s390_s7, 4  ;;  %s232_s8 = int_to_ptr.vmem [resolvable:$true] %s231_s8 }
  0x39   :  { %v271_v9 = vpack.c.bf16 %v67_v6, %v66_v4  ;;  %v277_v10 = vpack.c.bf16 %v64_v8, %v63_v7  ;;  %v65_v11 = vld [vmem:[%s482_s1] sm:$0x3]  ;;  %s354_s1 = scalar_lea.vmem %s232_s8, 32  ;;  %p359_p11 = scmp.lt.s32.totalorder %s232_s8, %s232_s8 }
  0x3a   :  { %275 = vmatpush3.bf16.msra.mxu1 %v274_v5  ;;  %v60_v12 = vld [vmem:[#allocation2] sm:$0x3]  ;;  %p355_p10 = scmp.ne.s32.totalorder %s232_s8, %s354_s1  ;;  %p360_p12 = scmp.lt.s32.totalorder %s354_s1, %s354_s1 }
  0x3b   :  { %272 = vmatpush3.bf16.msra.mxu0 %v271_v9  ;;  %276 = vmatprep.subr.bf16.mxu1 %v387_v0  ;;  %v243_v16 = vld [vmem:[%s485_s4] ss:$0 sm:$0xff] }
  0x3c   :  { %p361_p13 = por %p360_p12, %p359_p11 }
  0x3e   :  { %278 = vmatpush3.bf16.msra.mxu1 %v277_v10  ;;  %257 = vmatmul.mubr.msk.f32.vlgmr.msra.gmra.mrb[0].mxu0 %vm68_vm1, %v65_v11  ;;  %p362_p0 = pnand %p361_p13, %p355_p10 }
  0x41   :  { %268 = vmatmul.mubr.msk.f32.vlgmr.msra.gmra.mrb[0].mxu1 %vm142_vm2, %v60_v12 }
 0x111   :  { %v138_v13 = vpop.f32.mrb[0].mxu0 }
 0x112   :  { %v258_v14 = vpop.f32.mrb[1].mxu0 }
 0x114   :  { %v212_v15 = vpop.f32.mrb[0].mxu1 }
 0x115   :  { %v213_v17 = vadd.f32 %v212_v15, %v138_v13  ;;  %v269_v18 = vpop.f32.mrb[1].mxu1 }
 0x117   :  { %v223_v19 = vadd.f32 %v243_v16, %v213_v17 }
 0x119   :  { %224 = vst [vmem:[#allocation8] sm:$0x3] %v223_v19 }
 0x11a   :  { %365 = shalt.err (!%p362_p0)
}
 0x11b   :  { %s366_s11 = scalar_lea.hbm %s486_s5, 32 }
 0x11c   :  { %p367_p1 = scmp.ne.s32.totalorder %s486_s5, %s366_s11  ;;  %p370_p2 = scmp.lt.u32.totalorder %s366_s11, %s486_s5 }
 0x11e   :  { %p372_p3 = pnand %p370_p2, %p367_p1 }
 0x120   :  { %375 = shalt.err (!%p372_p3)
}
 0x121   :  { %234 = dma.vmem_to_hbm [thread:$0]  %s232_s8, 32, %s486_s5, [#allocation4]  }
 0x122   :  { %380 = dma.done.wait [#allocation4], 32  }
 0x123   :  { %381 = vsyncadd [#allocation4], 4294967264 }
 0x124   :  { %238 = vsyncpa [#allocation3], 1 }
 0x125   :  { %239 = vsyncpa [#allocation6], 1 }
 0x126   :  { %240 = vsyncpa [#allocation4], 1 }

</bundles_post_ra>
